<compile_context>
chip_gen: v7x
topology: tpu7x:2x2x1
jax: 0.10.0
libtpu: 0.0.40
codegen_flags: <defaults>
</compile_context>

<pallas_src>
import functools

import jax
import jax.numpy as jnp
from jax.experimental import pallas as pl
from jax.experimental.pallas import tpu as pltpu


# ------------------------------- small helpers --------------------------------

def _round_up(x, m):
    return (x + m - 1) // m * m


@functools.lru_cache(maxsize=None)
def _vmem_limit_bytes():
    """32 MiB on 64-MiB-VMEM parts (v7x), up to 64 MiB on 128-MiB parts (v5e/v6e)."""
    try:
        cap = int(pltpu.get_tpu_info().vmem_capacity_bytes)
    except Exception:
        cap = 64 * 1024 * 1024
    return min(96 * 1024 * 1024, max(32 * 1024 * 1024, cap // 2))


def _pick_row_tile(h, wv, n_batch, target_rows=512):
    """Largest row tile dividing h with th*wv <= target; keep >=2 grid steps
    (v7x megacore) whenever the batch alone does not provide them."""
    th = max(1, min(h, max(1, target_rows // max(wv, 1))))
    while h % th:
        th -= 1
    if n_batch * (h // th) < 2 and h % 2 == 0 and h >= 2:
        th = h // 2
    return th


# ------------------------------ Pallas kernels ---------------------------------

def _tconv_sp_kernel(x_ref, w_ref, o_ref, *, th, wv, w_valid, cin):
    """One (batch, row-tile) step of the fused sub-pixel transposed conv.

    x_ref: (1, H+2, Wv+2, Cin)  zero-padded bf16 NHWC image (whole image, resident)
    w_ref: (9*Cin, 4*Cout)      packed bf16 sub-pixel weights (resident)
    o_ref: (1, th, Wv, 4*Cout)  parity-packed output tile (channel = (py, px, cout))
    """
    r = pl.program_id(1)
    # Row band covering the tile plus the 1-row halo on each side.
    band = x_ref[0, pl.ds(r * th, th + 2), :, :]                 # (th+2, Wv+2, Cin)
    n_out = w_ref.shape[1]
    acc = jnp.zeros((th * wv, n_out), jnp.float32)
    for dy in range(3):                                          # row taps, unrolled
        # In-kernel im2col over the column taps -> lane order (dx, cin).
        cols = jnp.concatenate(
            [band[dy:dy + th, dx:dx + wv, :] for dx in range(3)], axis=-1)
        a2d = cols.reshape(th * wv, 3 * cin)                     # wv % 8 == 0
        acc += jnp.dot(a2d, w_ref[dy * 3 * cin:(dy + 1) * 3 * cin, :],
                       preferred_element_type=jnp.float32)
    if w_valid != wv:                                            # zero virtual-width pad
        col = jax.lax.broadcasted_iota(jnp.int32, (th * wv, n_out), 0) % wv
        acc = jnp.where(col < w_valid, acc, 0.0)
    y = jnp.maximum(acc, 0.0).reshape(th, wv, n_out)
    o_ref[0] = y.astype(o_ref.dtype)


def _matmul_relu_kernel(a_ref, b_ref, o_ref):
    acc = jnp.dot(a_ref[...], b_ref[...], preferred_element_type=jnp.float32)
    o_ref[...] = jnp.maximum(acc, 0.0).astype(o_ref.dtype)


# ------------------- transposed-conv -> sub-pixel conv glue --------------------

def build_subpixel_weight(wt):
    """Re-pack a ConvTranspose2d(k=5, s=2, p=2, op=1) weight (Cin, Cout, 5, 5) into
    the (9*Cin, 4*Cout) matrix of the equivalent stride-1 3x3 conv whose 4*Cout
    outputs are the four output-pixel parities (order p = 2*py + px).
    Row ordering: (window_row, window_col, cin); window index 0 <-> input row/col m-1.
    """
    cin, cout = wt.shape[0], wt.shape[1]
    wf = jnp.transpose(wt[:, :, ::-1, ::-1], (2, 3, 0, 1))       # (5, 5, Cin, Cout)
    parts = []
    for py in (0, 1):
        wr = wf[py::2]                                           # taps of row-parity py
        if py == 1:                                              # 2 taps -> rows 1..2
            wr = jnp.concatenate([jnp.zeros_like(wr[:1]), wr], axis=0)
        for px in (0, 1):
            wc = wr[:, px::2]
            if px == 1:
                wc = jnp.concatenate([jnp.zeros_like(wc[:, :1]), wc], axis=1)
            parts.append(wc)                                     # (3, 3, Cin, Cout)
    w = jnp.stack(parts, axis=3)                                 # (3, 3, Cin, 4, Cout)
    return w.reshape(9 * cin, 4 * cout)


def tconv5x5_sp(x, w_packed, w_valid, *, out_dtype):
    """ReLU(ConvTranspose2d(k=5, s=2, p=2, op=1, bias=False)) via a fused Pallas
    sub-pixel kernel.

    x:        (N, H, Wphys, Cin) NHWC; columns >= w_valid must be zero.
    w_packed: (9*Cin, 4*Cout) bf16 packed weight (build_subpixel_weight).
    Returns (y, 2*w_valid) with y: (N, 2H, 2*Wv, Cout), columns >= 2*w_valid zero.
    """
    n, h, wp_phys, cin = x.shape
    four_cout = w_packed.shape[1]
    cout = four_cout // 4
    assert w_packed.shape[0] == 9 * cin

    wv = _round_up(max(w_valid, 1), 8)                           # virtual width
    x = x.astype(jnp.bfloat16)
    if wp_phys >= wv:
        xc = x[:, :, :wv, :]
    else:
        xc = jnp.pad(x, ((0, 0), (0, 0), (0, wv - wp_phys), (0, 0)))
    xp = jnp.pad(xc, ((0, 0), (1, 1), (1, 1), (0, 0)))           # halo
    hp, wp = h + 2, wv + 2

    th = _pick_row_tile(h, wv, n)
    rt = h // th

    flops = 2 * n * h * wv * (9 * cin) * four_cout
    out_bytes = n * h * wv * four_cout * jnp.dtype(out_dtype).itemsize
    bytes_accessed = xp.size * 2 + w_packed.size * 2 + out_bytes

    y_pack = pl.pallas_call(
        functools.partial(_tconv_sp_kernel, th=th, wv=wv, w_valid=w_valid, cin=cin),
        out_shape=jax.ShapeDtypeStruct((n, h, wv, four_cout), out_dtype),
        grid_spec=pltpu.PrefetchScalarGridSpec(
            num_scalar_prefetch=0,
            grid=(n, rt),
            in_specs=[
                pl.BlockSpec((1, hp, wp, cin), lambda i, r: (i, 0, 0, 0)),
                pl.BlockSpec((9 * cin, four_cout), lambda i, r: (0, 0)),
            ],
            out_specs=pl.BlockSpec((1, th, wv, four_cout), lambda i, r: (i, r, 0, 0)),
        ),
        compiler_params=pltpu.CompilerParams(
            dimension_semantics=("parallel", "parallel"),
            vmem_limit_bytes=_vmem_limit_bytes(),
        ),
        cost_estimate=pl.CostEstimate(
            flops=flops, transcendentals=0, bytes_accessed=bytes_accessed),
    )(xp, w_packed)

    # Depth-to-space (parity un-shuffle).  Kept in XLA for now.
    # TODO(synk): fold this into the next layer's in-kernel gather / weight packing.
    y = y_pack.reshape(n, h, wv, 2, 2, cout).transpose(0, 1, 3, 2, 4, 5)
    y = y.reshape(n, 2 * h, 2 * wv, cout)
    return y, 2 * w_valid


def conv1x1_relu(x, w_mat, *, out_dtype=jnp.float32):
    """ReLU(Conv2d 1x1, bias=False).  x: (N, H, W, Cin); w_mat: (Cin, Cout) bf16."""
    n, h, w, cin = x.shape
    cout = w_mat.shape[1]
    m = n * h * w
    tm = 256
    mp = _round_up(m, tm)
    a = x.reshape(m, cin).astype(jnp.bfloat16)
    if mp != m:
        a = jnp.pad(a, ((0, mp - m), (0, 0)))
    y = pl.pallas_call(
        _matmul_relu_kernel,
        out_shape=jax.ShapeDtypeStruct((mp, cout), out_dtype),
        grid_spec=pltpu.PrefetchScalarGridSpec(
            num_scalar_prefetch=0,
            grid=(mp // tm,),
            in_specs=[pl.BlockSpec((tm, cin), lambda i: (i, 0)),
                      pl.BlockSpec((cin, cout), lambda i: (0, 0))],
            out_specs=pl.BlockSpec((tm, cout), lambda i: (i, 0)),
        ),
        compiler_params=pltpu.CompilerParams(
            dimension_semantics=("parallel",),
            vmem_limit_bytes=_vmem_limit_bytes(),
        ),
        cost_estimate=pl.CostEstimate(
            flops=2 * mp * cin * cout, transcendentals=0,
            bytes_accessed=mp * cin * 2 + cin * cout * 2 + mp * cout * 4),
    )(a, w_mat)
    if mp != m:
        y = y[:m]
    return y.reshape(n, h, w, cout)


# ------------------------------- full forward ----------------------------------

def latent_upsampler_forward(packed, feats, type_upscale):
    """Pallas forward of LatentUpsampler.forward().

    packed = pack_params(...) (bf16 packed weights, built once outside jit).
    feats  = [f0, f1, f2, f3] in NCHW (PyTorch layout, x[0..3]).  Returns NCHW latent.
    """
    f0, f1, f2, f3 = (jnp.transpose(f, (0, 2, 3, 1)) for f in feats)   # -> NHWC once

    if type_upscale == "naive_concat":
        def chain(x, ws):
            y, w_valid = x, x.shape[2]
            for i, wm in enumerate(ws):
                last = i == len(ws) - 1
                y, w_valid = tconv5x5_sp(
                    y, wm, w_valid,
                    out_dtype=jnp.float32 if last else jnp.bfloat16)
            return y[:, :, :w_valid, :]
        f3_up = chain(f3, packed["tconv3"])
        f2_up = chain(f2, packed["tconv2"])
        f1_up = chain(f1, packed["tconv1"])
        latent = jnp.concatenate([f0, f1_up, f2_up, f3_up], axis=-1)
    else:
        f3_up, _ = tconv5x5_sp(f3, packed["tconv0"], f3.shape[2],
                               out_dtype=jnp.bfloat16)
        f2_c = jnp.concatenate(
            [f2.astype(jnp.bfloat16), f3_up[:, :, :f2.shape[2], :]], axis=-1)
        f2_up, _ = tconv5x5_sp(f2_c, packed["tconv1"], f2.shape[2],
                               out_dtype=jnp.bfloat16)
        f1_c = jnp.concatenate(
            [f1.astype(jnp.bfloat16), f2_up[:, :, :f1.shape[2], :]], axis=-1)
        f1_up, _ = tconv5x5_sp(f1_c, packed["tconv2"], f1.shape[2],
                               out_dtype=jnp.bfloat16)
        f0_c = jnp.concatenate(
            [f0.astype(jnp.bfloat16), f1_up[:, :, :f0.shape[2], :]], axis=-1)
        if type_upscale == "concat_smart1":
            lat, v0 = tconv5x5_sp(f0_c, packed["tconv3"], f0.shape[2],
                                  out_dtype=jnp.float32)
            latent = lat[:, :, :v0, :]
        else:  # concat_smart2
            latent = conv1x1_relu(f0_c, packed["tconv3"], out_dtype=jnp.float32)
    return jnp.transpose(latent, (0, 3, 1, 2))                          # -> NCHW


# ------------------------------ parameter handling ------------------------------

def init_tconv_w(key, cin, cout):
    # ConvTranspose2d weight layout: (Cin, Cout, 5, 5).
    scale = (2.0 / (cout * 25)) ** 0.5
    return scale * jax.random.normal(key, (cin, cout, 5, 5), jnp.float32)


def init_conv1x1_w(key, cin, cout):
    # Conv2d weight layout: (Cout, Cin, 1, 1).
    scale = (2.0 / cin) ** 0.5
    return scale * jax.random.normal(key, (cout, cin, 1, 1), jnp.float32)


def make_params(key, type_upscale):
    ks = jax.random.split(key, 6)
    if type_upscale == "naive_concat":
        planes = [256, 128, 64]
        return {
            "tconv3": [init_tconv_w(ks[i], planes[0], planes[0]) for i in range(3)],
            "tconv2": [init_tconv_w(ks[3 + i], planes[1], planes[1]) for i in range(2)],
            "tconv1": [init_tconv_w(ks[5], planes[2], planes[2])],
        }
    inplanes = 256
    planes = ([128, 64, 64, 128] if type_upscale == "concat_smart1"
              else [128, 64, 64, 256])
    p = {
        "tconv0": init_tconv_w(ks[0], inplanes, planes[0]),
        "tconv1": init_tconv_w(ks[1], inplanes, planes[1]),
        "tconv2": init_tconv_w(ks[2], planes[0], planes[2]),
    }
    if type_upscale == "concat_smart1":
        p["tconv3"] = init_tconv_w(ks[3], planes[0], planes[3])
    else:
        p["tconv3"] = init_conv1x1_w(ks[3], planes[0], planes[3])
    return p


def pack_params(params, type_upscale):
    """Pre-pack weights (done once, outside the jitted forward)."""
    if type_upscale == "naive_concat":
        return {k: [build_subpixel_weight(w).astype(jnp.bfloat16) for w in v]
                for k, v in params.items()}
    out = {k: build_subpixel_weight(params[k]).astype(jnp.bfloat16)
           for k in ("tconv0", "tconv1", "tconv2")}
    if type_upscale == "concat_smart1":
        out["tconv3"] = build_subpixel_weight(params["tconv3"]).astype(jnp.bfloat16)
    else:
        wc = params["tconv3"]                                    # (Cout, Cin, 1, 1)
        out["tconv3"] = jnp.transpose(wc[:, :, 0, 0], (1, 0)).astype(jnp.bfloat16)
    return out


# ------------------------------ pure-JAX reference -------------------------------

def reference_tconv5x5_relu(x_nhwc, wt):
    """ReLU(ConvTranspose2d(k=5, s=2, p=2, op=1, bias=False)) as an lhs-dilated conv
    with the flipped kernel, same bf16-operand / f32-accumulation scheme."""
    x = jnp.transpose(x_nhwc, (0, 3, 1, 2)).astype(jnp.bfloat16)                # NCHW
    w = jnp.transpose(wt[:, :, ::-1, ::-1], (1, 0, 2, 3)).astype(jnp.bfloat16)  # OIHW
    y = jax.lax.conv_general_dilated(
        x, w, window_strides=(1, 1), padding=((2, 3), (2, 3)),
        lhs_dilation=(2, 2), rhs_dilation=(1, 1),
        dimension_numbers=("NCHW", "OIHW", "NCHW"),
        preferred_element_type=jnp.float32)
    return jnp.transpose(jnp.maximum(y, 0.0), (0, 2, 3, 1))


def reference_forward(params, feats, type_upscale):
    f0, f1, f2, f3 = (jnp.transpose(f, (0, 2, 3, 1)) for f in feats)
    if type_upscale == "naive_concat":
        def chain(x, ws):
            for wt in ws:
                x = reference_tconv5x5_relu(x, wt)
            return x
        latent = jnp.concatenate(
            [f0, chain(f1, params["tconv1"]), chain(f2, params["tconv2"]),
             chain(f3, params["tconv3"])], axis=-1)
    else:
        f3_up = reference_tconv5x5_relu(f3, params["tconv0"])
        f2_up = reference_tconv5x5_relu(jnp.concatenate([f2, f3_up], -1),
                                        params["tconv1"])
        f1_up = reference_tconv5x5_relu(jnp.concatenate([f1, f2_up], -1),
                                        params["tconv2"])
        f0_c = jnp.concatenate([f0, f1_up], -1)
        if type_upscale == "concat_smart1":
            latent = reference_tconv5x5_relu(f0_c, params["tconv3"])
        else:
            wc = params["tconv3"][:, :, 0, 0]                    # (Cout, Cin)
            y = jnp.einsum("nhwc,oc->nhwo", f0_c.astype(jnp.bfloat16),
                           wc.astype(jnp.bfloat16),
                           preferred_element_type=jnp.float32)
            latent = jnp.maximum(y, 0.0)
    return jnp.transpose(latent, (0, 3, 1, 2))


# ---------------------------------- main -----------------------------------------

if __name__ == "__main__":
    key = jax.random.PRNGKey(0)
    k_feat, k_par = jax.random.split(key)
    kf = jax.random.split(k_feat, 4)
    N, S = 2, 16
    # ResNet-style feature pyramid (NCHW, PyTorch layout): f0 finest ... f3 coarsest.
    f0 = jax.random.normal(kf[0], (N, 64, S, S), jnp.float32)
    f1 = jax.random.normal(kf[1], (N, 64, S // 2, S // 2), jnp.float32)
    f2 = jax.random.normal(kf[2], (N, 128, S // 4, S // 4), jnp.float32)
    f3 = jax.random.normal(kf[3], (N, 256, S // 8, S // 8), jnp.float32)
    feats = [f0, f1, f2, f3]

    def _close(got, ref, scale=5e-2):
        diff = float(jnp.max(jnp.abs(got - ref)))
        bound = scale * (1.0 + float(jnp.max(jnp.abs(ref))))
        assert diff < bound, (diff, bound)

    p_naive = make_params(k_par, "naive_concat")
    pk_naive = pack_params(p_naive, "naive_concat")

    # Check 1: single fused tconv layer (lane/sublane friendly width).
    f1_nhwc = jnp.transpose(f1, (0, 2, 3, 1))
    got = jax.jit(lambda a, w: tconv5x5_sp(a, w, a.shape[2],
                                           out_dtype=jnp.float32)[0])(
        f1_nhwc, pk_naive["tconv1"][0])
    ref = jax.jit(reference_tconv5x5_relu)(f1_nhwc, p_naive["tconv1"][0])
    jax.block_until_ready((got, ref))
    assert got.shape == ref.shape == (N, S, S, 64)
    _close(got, ref)

    # Check 2: coarse layer (W=2 < 8) -> exercises the virtual-width masking path.
    f3_nhwc = jnp.transpose(f3, (0, 2, 3, 1))

    def _one(a, w):
        y, v = tconv5x5_sp(a, w, a.shape[2], out_dtype=jnp.float32)
        return y, y[:, :, :v, :]

    y_full, got3 = jax.jit(_one)(f3_nhwc, pk_naive["tconv3"][0])
    ref3 = jax.jit(reference_tconv5x5_relu)(f3_nhwc, p_naive["tconv3"][0])
    jax.block_until_ready((y_full, got3, ref3))
    assert got3.shape == ref3.shape == (N, 4, 4, 256)
    _close(got3, ref3)
    assert float(jnp.max(jnp.abs(y_full[:, :, 4:, :]))) == 0.0   # masked cols exact 0

    # naive_concat: full forward vs XLA reference.
    fwd_naive = jax.jit(functools.partial(latent_upsampler_forward,
                                          type_upscale="naive_concat"))
    latent = fwd_naive(pk_naive, feats)
    latent_ref = jax.jit(functools.partial(reference_forward,
                                           type_upscale="naive_concat"))(p_naive, feats)
    jax.block_until_ready((latent, latent_ref))
    assert latent.shape == (N, 64 + 64 + 128 + 256, S, S)
    _close(latent, latent_ref)

    # concat_smart1 (shape check).
    p_s1 = make_params(k_par, "concat_smart1")
    pk_s1 = pack_params(p_s1, "concat_smart1")
    lat1 = jax.jit(functools.partial(latent_upsampler_forward,
                                     type_upscale="concat_smart1"))(pk_s1, feats)
    jax.block_until_ready(lat1)
    assert lat1.shape == (N, 128, 2 * S, 2 * S)

    # concat_smart2: full forward vs XLA reference (exercises concat plumbing + 1x1).
    p_s2 = make_params(k_par, "concat_smart2")
    pk_s2 = pack_params(p_s2, "concat_smart2")
    lat2 = jax.jit(functools.partial(latent_upsampler_forward,
                                     type_upscale="concat_smart2"))(pk_s2, feats)
    lat2_ref = jax.jit(functools.partial(reference_forward,
                                         type_upscale="concat_smart2"))(p_s2, feats)
    jax.block_until_ready((lat2, lat2_ref))
    assert lat2.shape == (N, 256, S, S)
    _close(lat2, lat2_ref)

    print("KERNEL_OK")
</pallas_src>

<mosaic_0001>
module attributes {stable_mosaic.version = 11 : i64} {
  func.func @_tconv_sp_kernel(%arg0: i32, %arg1: i32, %arg2: memref<1x10x10x64xbf16, #tpu.memory_space<vmem>>, %arg3: memref<576x256xbf16, #tpu.memory_space<vmem>>, %arg4: memref<1x8x8x256xf32, #tpu.memory_space<vmem>>) attributes {dimension_semantics = [#tpu.dimension_semantics<parallel>, #tpu.dimension_semantics<parallel>], iteration_bounds = array<i64: 2, 1>, scalar_prefetch = 0 : i64, scratch_operands = 0 : i64, tpu.core_type = #tpu.core_type<tc>, window_params = [{transform_indices = @transform_0, window_bounds = array<i64: 1, 10, 10, 64>}, {pipeline_mode = #tpu.pipeline_mode<synchronous>, transform_indices = @transform_1, window_bounds = array<i64: 576, 256>}, {transform_indices = @transform_2, window_bounds = array<i64: 1, 8, 8, 256>}]} {
    %c8_i32 = arith.constant 8 : i32
    %0 = arith.muli %arg1, %c8_i32 : i32
    %c0 = arith.constant 0 : index
    %1 = arith.index_cast %0 : i32 to index
    %c0_0 = arith.constant 0 : index
    %c0_1 = arith.constant 0 : index
    %2 = vector.load %arg2[%c0, %1, %c0_0, %c0_1] : memref<1x10x10x64xbf16, #tpu.memory_space<vmem>>, vector<1x10x10x64xbf16>
    %3 = vector.shape_cast %2 : vector<1x10x10x64xbf16> to vector<10x10x64xbf16>
    %cst = arith.constant 0.000000e+00 : f32
    %4 = vector.broadcast %cst : f32 to vector<64x256xf32>
    %5 = vector.extract_strided_slice %3 {offsets = [0, 0, 0], sizes = [8, 8, 64], strides = [1, 1, 1]} : vector<10x10x64xbf16> to vector<8x8x64xbf16>
    %6 = vector.extract_strided_slice %3 {offsets = [0, 1, 0], sizes = [8, 8, 64], strides = [1, 1, 1]} : vector<10x10x64xbf16> to vector<8x8x64xbf16>
    %7 = vector.extract_strided_slice %3 {offsets = [0, 2, 0], sizes = [8, 8, 64], strides = [1, 1, 1]} : vector<10x10x64xbf16> to vector<8x8x64xbf16>
    %8 = tpu.concatenate %5, %6, %7 in 2 : vector<8x8x64xbf16>, vector<8x8x64xbf16>, vector<8x8x64xbf16> -> vector<8x8x192xbf16>
    %9 = vector.shape_cast %8 : vector<8x8x192xbf16> to vector<64x192xbf16>
    %c0_2 = arith.constant 0 : index
    %c0_3 = arith.constant 0 : index
    %10 = vector.load %arg3[%c0_2, %c0_3] : memref<576x256xbf16, #tpu.memory_space<vmem>>, vector<192x256xbf16>
    %cst_4 = arith.constant dense<0.000000e+00> : vector<64x256xf32>
    %11 = tpu.matmul %9, %10, %cst_4 {dimension_numbers = #tpu.dot_dimension_numbers<[1], [0], [0], [1], [0, 0, 1, 1], [], []>} : vector<64x192xbf16>, vector<192x256xbf16>, vector<64x256xf32> -> vector<64x256xf32>
    %12 = arith.addf %4, %11 : vector<64x256xf32>
    %13 = vector.extract_strided_slice %3 {offsets = [1, 0, 0], sizes = [8, 8, 64], strides = [1, 1, 1]} : vector<10x10x64xbf16> to vector<8x8x64xbf16>
    %14 = vector.extract_strided_slice %3 {offsets = [1, 1, 0], sizes = [8, 8, 64], strides = [1, 1, 1]} : vector<10x10x64xbf16> to vector<8x8x64xbf16>
    %15 = vector.extract_strided_slice %3 {offsets = [1, 2, 0], sizes = [8, 8, 64], strides = [1, 1, 1]} : vector<10x10x64xbf16> to vector<8x8x64xbf16>
    %16 = tpu.concatenate %13, %14, %15 in 2 : vector<8x8x64xbf16>, vector<8x8x64xbf16>, vector<8x8x64xbf16> -> vector<8x8x192xbf16>
    %17 = vector.shape_cast %16 : vector<8x8x192xbf16> to vector<64x192xbf16>
    %c192 = arith.constant 192 : index
    %c0_5 = arith.constant 0 : index
    %18 = vector.load %arg3[%c192, %c0_5] : memref<576x256xbf16, #tpu.memory_space<vmem>>, vector<192x256xbf16>
    %cst_6 = arith.constant dense<0.000000e+00> : vector<64x256xf32>
    %19 = tpu.matmul %17, %18, %cst_6 {dimension_numbers = #tpu.dot_dimension_numbers<[1], [0], [0], [1], [0, 0, 1, 1], [], []>} : vector<64x192xbf16>, vector<192x256xbf16>, vector<64x256xf32> -> vector<64x256xf32>
    %20 = arith.addf %12, %19 : vector<64x256xf32>
    %21 = vector.extract_strided_slice %3 {offsets = [2, 0, 0], sizes = [8, 8, 64], strides = [1, 1, 1]} : vector<10x10x64xbf16> to vector<8x8x64xbf16>
    %22 = vector.extract_strided_slice %3 {offsets = [2, 1, 0], sizes = [8, 8, 64], strides = [1, 1, 1]} : vector<10x10x64xbf16> to vector<8x8x64xbf16>
    %23 = vector.extract_strided_slice %3 {offsets = [2, 2, 0], sizes = [8, 8, 64], strides = [1, 1, 1]} : vector<10x10x64xbf16> to vector<8x8x64xbf16>
    %24 = tpu.concatenate %21, %22, %23 in 2 : vector<8x8x64xbf16>, vector<8x8x64xbf16>, vector<8x8x64xbf16> -> vector<8x8x192xbf16>
    %25 = vector.shape_cast %24 : vector<8x8x192xbf16> to vector<64x192xbf16>
    %c384 = arith.constant 384 : index
    %c0_7 = arith.constant 0 : index
    %26 = vector.load %arg3[%c384, %c0_7] : memref<576x256xbf16, #tpu.memory_space<vmem>>, vector<192x256xbf16>
    %cst_8 = arith.constant dense<0.000000e+00> : vector<64x256xf32>
    %27 = tpu.matmul %25, %26, %cst_8 {dimension_numbers = #tpu.dot_dimension_numbers<[1], [0], [0], [1], [0, 0, 1, 1], [], []>} : vector<64x192xbf16>, vector<192x256xbf16>, vector<64x256xf32> -> vector<64x256xf32>
    %28 = arith.addf %20, %27 : vector<64x256xf32>
    %cst_9 = arith.constant 0.000000e+00 : f32
    %29 = vector.broadcast %cst_9 : f32 to vector<64x256xf32>
    %30 = arith.maximumf %28, %29 : vector<64x256xf32>
    %31 = vector.shape_cast %30 : vector<64x256xf32> to vector<8x8x256xf32>
    %c0_10 = arith.constant 0 : index
    %c0_11 = arith.constant 0 : index
    %c0_12 = arith.constant 0 : index
    %c0_13 = arith.constant 0 : index
    %32 = vector.load %arg4[%c0_10, %c0_11, %c0_12, %c0_13] : memref<1x8x8x256xf32, #tpu.memory_space<vmem>>, vector<1x8x8x256xf32>
    %33 = vector.shape_cast %32 : vector<1x8x8x256xf32> to vector<8x8x256xf32>
    %34 = vector.shape_cast %31 : vector<8x8x256xf32> to vector<1x8x8x256xf32>
    tpu.vector_store %arg4[%c0_10, %c0_11, %c0_12, %c0_13], %34 {strides = array<i32>} : memref<1x8x8x256xf32, #tpu.memory_space<vmem>>, vector<1x8x8x256xf32>,
    return
  }
  func.func @transform_0(%arg0: i32, %arg1: i32) -> (i32, i32, i32, i32) {
    %c0_i32 = arith.constant 0 : i32
    %c0_i32_0 = arith.constant 0 : i32
    %c0_i32_1 = arith.constant 0 : i32
    %c0_i32_2 = arith.constant 0 : i32
    return %arg0, %c0_i32, %c0_i32_0, %c0_i32_1 : i32, i32, i32, i32
  }
  func.func @transform_1(%arg0: i32, %arg1: i32) -> (i32, i32) {
    %c0_i32 = arith.constant 0 : i32
    %c0_i32_0 = arith.constant 0 : i32
    %c0_i32_1 = arith.constant 0 : i32
    return %c0_i32, %c0_i32_0 : i32, i32
  }
  func.func @transform_2(%arg0: i32, %arg1: i32) -> (i32, i32, i32, i32) {
    %c0_i32 = arith.constant 0 : i32
    %c0_i32_0 = arith.constant 0 : i32
    %c0_i32_1 = arith.constant 0 : i32
    return %arg0, %arg1, %c0_i32, %c0_i32_0 : i32, i32, i32, i32
  }
}

</mosaic_0001>

<bundles_post_ra>
// kernel: _lambda_.1
= control target key start
LH: loop header
LB: loop body
LE: loop exit
PB: predicated region body
PF: predicated region fallthrough
CT: control target
= control target key end

     0   :  { %7 = vsyncpa [#allocation3], 0  ;;  %s1687_s9 = smov 0   ;;  %s1689_s10 = smov 0   ;;  %s1973_s0 = inlined_call_operand.vmem [shape: bf16[2,10,10,64], index: 0, kind: input, shape index: {}]   ;;  %s1974_s1 = inlined_call_operand.hbm [shape: bf16[576,256], index: 1, kind: input, shape index: {}]   ;;  %s1975_s2 = inlined_call_operand.vmem [shape: f32[2,8,8,256], index: 2, kind: output, shape index: {}]  }
   0x1   :  { %s1691_s11 = smov 0  }
   0x2 LB: > { %s1274_s12 = sadd.s32 4294967295, %s1666_s11   ;;  %s25_s13 = sadd.s32 1, %s1662_s10  ;;  %s1666_s11 = sphi %s1691_s11, %s13_s11   ;;  %s1662_s10 = sphi %s1689_s10, %s1985_s10   ;;  %s1658_s9 = sphi %s1687_s9, %s1984_s9  }
   0x3   : > { %p27_p0 = scmp.ge.s32.totalorder %s25_s13, 2  ;;  %p1276_p1 = scmp.ge.s32.totalorder %s1666_s11, 1 }
   0x4   : > { %p105_p2 = scmp.lt.s32.totalorder %s1666_s11, 3  ;;  %p1712_p4 = scmp.eq.s32.totalorder %s1274_s12, 0 }
   0x5   : > { %s1987_s13 = smov (%p27_p0, %s25_s13), 0  ;;  %s1668_s16 = smov [#allocation2]  }
   0x6   : > { %p1708_p3 = pnand %p1276_p1, %p105_p2  ;;  %s117_s17 = sshll.u32 %s1668_s16, 4  ;;  %s118_s17 = int_to_ptr.vmem [resolvable:$true] %s117_s17 }
   0x7   : > { %s1980_s15 = scalar_select %p1712_p4, 1, 0 }
   0x8   : > { %s1979_s14 = scalar_select %p1708_p3, 1, 0 }
   0x9   : > { %p1460_p5 = pneg %p1708_p3  ;;  %s1612_s21 = scalar_lea.hbm %s1974_s1, 9216 }
   0xa   : > { %p1613_p7 = scmp.ne.s32.totalorder %s1974_s1, %s1612_s21  ;;  %p1619_p11 = scmp.lt.u32.totalorder %s1612_s21, %s1974_s1 }
   0xb   : > { %p1720_p6 = pnand %p1712_p4, %p1460_p5 }
   0xd   : > { %p1614_p8 = pneg %p1720_p6 }
   0xf   : > { %p1615_p9 = pnand %p1614_p8, %p1613_p7 }
  0x11   : > { %p1616_p10 = pneg %p1615_p9 }
  0x13   : > { %p1621_p12 = pnand %p1619_p11, %p1616_p10 }
  0x15   : > { %1624 = shalt.err (!%p1621_p12)
}
  0x16   : > { %s1625_s26 = scalar_lea.vmem %s118_s17, 9216  ;;  %p1633_p2 = scmp.lt.s32.totalorder %s118_s17, %s118_s17 }
  0x17   : > { %p1626_p13 = scmp.ne.s32.totalorder %s118_s17, %s1625_s26  ;;  %p1634_p5 = scmp.lt.s32.totalorder %s1625_s26, %s1625_s26 }
  0x19   : > { %p1628_p0 = pnand %p1626_p13, %p1614_p8  ;;  %p1635_p4 = por %p1634_p5, %p1633_p2 }
  0x1b   : > { %p1629_p1 = pneg %p1628_p0 }
  0x1d   : > { %p1636_p3 = pnand %p1635_p4, %p1629_p1 }
  0x1f   : > { %1639 = shalt.err (!%p1636_p3)
}
  0x20   : > { %s1669_s27 = smov 128   ;;  %s1670_s28 = smov 8  }
  0x21   : > { %1463 = dma.hbm_to_vmem [thread:$0]  (!%p1720_p6), %s1974_s1, 9216, %s118_s17, [#allocation3], %s1669_s27, %s1669_s27, %s1670_s28  }
  0x22   : > { %p1982_p7 = scmp.ne.s32.totalorder %s1979_s14, 0 }
  0x23   : > { %p1983_p9 = scmp.ne.s32.totalorder (!%p1982_p7), %s1980_s15, 0 }
  0x24   : > { %141 = sbr.rel (%p1982_p7) target bundleno = 458 (0x1ca), region = 28 }
  0x2b   : > { %1653 = dma.done.wait (%p1983_p9), [#allocation3], 9216  }
  0x2c   : > { %1655 = vsyncadd (%p1983_p9), [#allocation3], 4294958080  ;;  %p168_p3 = scmp.lt.s32.totalorder %s1658_s9, 1  ;;  %s1671_s7 = smov 64   ;;  %v1504_v52 = vld [vmem:[#allocation2 + $0xc4] ss:$8 sps:$4 sm:$0xff]  }
  0x2d   : > { %v1506_v53 = vld [vmem:[#allocation2 + $0x4] ss:$8 sps:$4 sm:$0xff]   ;;  %v1508_v57 = vld [vmem:[#allocation2 + $0xc0] ss:$8 sps:$4 sm:$0xff]   ;;  %591 = vmatprep.subr.bf16.mxu1 %v1504_v52  ;;  %vm329_vm0 = vcmask 523264  }
  0x2e   : > { %s1989_s9 = smov (!%p168_p3, %s1658_s9), 1  ;;  %808 = vmatprep.subr.bf16.mxu0 %v1506_v53  ;;  %v1509_v61 = vld [vmem:[#allocation2] ss:$8 sps:$4 sm:$0xff]   ;;  %592 = vmatpush1.bf16.msra.mxu1 %v1508_v57  ;;  %v1534_v52 = vld [vmem:[#allocation2 + $0x114] ss:$8 sps:$4 sm:$0xff]  }
  0x2f   : > { %s1455_s3 = smul.u32 80, %s1989_s9  ;;  %809 = vmatpush1.bf16.msra.mxu0 %v1509_v61  ;;  %v1536_v53 = vld [vmem:[#allocation2 + $0x54] ss:$8 sps:$4 sm:$0xff]   ;;  %v1539_v57 = vld [vmem:[#allocation2 + $0x50] ss:$8 sps:$4 sm:$0xff]   ;;  %s1398_s8 = sshll.u32 %s1989_s9, 7 }
  0x30   : > { %s1942_s15 = scalar_lea.vmem %s1975_s2, %s1398_s8 }
  0x31   : > { %s1754_s6 = scalar_lea.vmem %s1973_s0, %s1455_s3 }
  0x32   : > { %v1757_v0 = vld [vmem:[%s1754_s6 + $0x10] sm:$0xf]  ;;  %v194_v1 = vld [vmem:[%s1754_s6 + $0x14] sm:$0x1]  ;;  %v1761_v2 = vld [vmem:[%s1754_s6] sm:$0xf] }
  0x33   : > { %v1764_v3 = vcombine.low %v1757_v0, %v194_v1  ;;  %v190_v4 = vld [vmem:[%s1754_s6 + $0x4] sm:$0x1]  ;;  %v1768_v5 = vld [vmem:[%s1754_s6 + $0x18] sm:$0xf]  ;;  %v196_v6 = vld [vmem:[%s1754_s6 + $0x1c] sm:$0x1] }
  0x34   : > { %v1772_v7 = vcombine.low %v1761_v2, %v190_v4  ;;  %v1775_v8 = vcombine.low %v1768_v5, %v196_v6  ;;  %v1778_v9 = vld [vmem:[%s1754_s6 + $0x8] sm:$0xf]  ;;  %v192_v10 = vld [vmem:[%s1754_s6 + $0xc] sm:$0x1]  ;;  %v1782_v11 = vld [vmem:[%s1754_s6 + $0x20] sm:$0xf] }
  0x35   : > { %v264_v12 = vshrl.u32 %v1764_v3, 16  ;;  %v266_v13 = vshll.u32 %v1764_v3, 16  ;;  %v1787_v14 = vcombine.low %v1778_v9, %v192_v10  ;;  %v198_v15 = vld [vmem:[%s1754_s6 + $0x24] sm:$0x1]  ;;  %v1791_v16 = vld [vmem:[%s1754_s6 + $0x28] sm:$0xf] }
  0x36   : > { %v250_v17 = vshrl.u32 %v1772_v7, 16  ;;  %v252_v18 = vshll.u32 %v1772_v7, 16  ;;  %v271_v19 = vshrl.u32 %v1775_v8, 16  ;;  %v273_v20 = vshll.u32 %v1775_v8, 16  ;;  %v200_v21 = vld [vmem:[%s1754_s6 + $0x2c] sm:$0x1] }
  0x37   : > { %v268_v22 = vrot.slane %v266_v13, 1  ;;  %v257_v23 = vshrl.u32 %v1787_v14, 16  ;;  %v259_v24 = vshll.u32 %v1787_v14, 16  ;;  %v1801_v25 = vcombine.low %v1782_v11, %v198_v15  ;;  %v1804_v26 = vld [vmem:[%s1754_s6 + $0x30] sm:$0xf] }
  0x38   : > { %v254_v27 = vrot.slane %v252_v18, 1  ;;  %v275_v28 = vrot.slane %v273_v20, 1  ;;  %v1807_v29 = vcombine.low %v1791_v16, %v200_v21  ;;  %v202_v30 = vld [vmem:[%s1754_s6 + $0x34] sm:$0x1]  ;;  %v1811_v31 = vld [vmem:[%s1754_s6 + $0x38] sm:$0xf] }
  0x39   : > { %v269_v32 = vor.u32 %v268_v22, %v264_v12  ;;  %v261_v33 = vrot.slane %v259_v24, 1  ;;  %v278_v34 = vshrl.u32 %v1801_v25, 16  ;;  %v280_v35 = vshll.u32 %v1801_v25, 16  ;;  %v204_v36 = vld [vmem:[%s1754_s6 + $0x3c] sm:$0x1] }
  0x3a   : > { %v255_v37 = vor.u32 %v254_v27, %v250_v17  ;;  %v285_v38 = vshrl.u32 %v1807_v29, 16  ;;  %v287_v39 = vshll.u32 %v1807_v29, 16  ;;  %v1819_v40 = vld [vmem:[%s1754_s6 + $0x40] sm:$0xf]  ;;  %v206_v41 = vld [vmem:[%s1754_s6 + $0x44] sm:$0x1]  ;;  %v276_v42 = vor.u32 %v275_v28, %v271_v19 }
  0x3b   : > { %309 = vrot.lane.b32.xlu1 %v269_v32, %s1671_s7  ;;  %v282_v43 = vrot.slane %v280_v35, 1  ;;  %v1824_v44 = vcombine.low %v1804_v26, %v202_v30  ;;  %v1827_v45 = vcombine.low %v1811_v31, %v204_v36  ;;  %v1830_v46 = vld [vmem:[%s1754_s6 + $0x48] sm:$0xf]  ;;  %v208_v47 = vld [vmem:[%s1754_s6 + $0x4c] sm:$0x1]  ;;  %v262_v48 = vor.u32 %v261_v33, %v257_v23 }
  0x3c   : > { %305 = vrot.lane.b32.xlu0 %v255_v37, %s1671_s7  ;;  %v289_v49 = vrot.slane %v287_v39, 1  ;;  %v1835_v50 = vcombine.low %v1819_v40, %v206_v41  ;;  %v1838_v51 = vcombine.low %v1830_v46, %v208_v47  ;;  %v1510_v6 = vld [vmem:[#allocation2 + $0xd4] ss:$8 sps:$4 sm:$0xff]   ;;  %v1514_v18 = vld [vmem:[#allocation2 + $0xd0] ss:$8 sps:$4 sm:$0xff]   ;;  %v322_v21 = vrot.slane %v1787_v14, 1 }
  0x3d   : > { %v292_v54 = vshrl.u32 %v1824_v44, 16  ;;  %v294_v55 = vshll.u32 %v1824_v44, 16  ;;  %v299_v56 = vshrl.u32 %v1827_v45, 16  ;;  %v301_v58 = vshll.u32 %v1827_v45, 16  ;;  %v1512_v15 = vld [vmem:[#allocation2 + $0x14] ss:$8 sps:$4 sm:$0xff]   ;;  %593 = vmatprep.subr.bf16.mxu1 %v1510_v6 }
  0x3e   : > { %v408_v59 = vshrl.u32 %v1835_v50, 16  ;;  %v410_v60 = vshll.u32 %v1835_v50, 16  ;;  %v290_v62 = vor.u32 %v289_v49, %v285_v38  ;;  %v887_v1 = vshrl.u32 %v1838_v51, 16  ;;  %v1515_v19 = vld [vmem:[#allocation2 + $0x10] ss:$8 sps:$4 sm:$0xff]   ;;  %810 = vmatprep.subr.bf16.mxu0 %v1512_v15  ;;  %594 = vmatpush1.bf16.msra.mxu1 %v1514_v18 }
  0x3f   : > { %311 = vrot.lane.b32.xlu1 %v276_v42, %s1671_s7  ;;  %v296_v63 = vrot.slane %v294_v55, 1  ;;  %v889_v4 = vshll.u32 %v1838_v51, 16  ;;  %v283_v10 = vor.u32 %v282_v43, %v278_v34  ;;  %v303_v12 = vrot.slane %v301_v58, 1  ;;  %v1516_v20 = vld [vmem:[#allocation2 + $0xe4] ss:$8 sps:$4 sm:$0xff]   ;;  %811 = vmatpush1.bf16.msra.mxu0 %v1515_v19 }
  0x40   : > { %307 = vrot.lane.b32.xlu0 %v262_v48, %s1671_s7  ;;  %v412_v13 = vrot.slane %v410_v60, 1  ;;  %v323_v22 = vrot.slane %v1764_v3, 1  ;;  %v1518_v24 = vld [vmem:[#allocation2 + $0x24] ss:$8 sps:$4 sm:$0xff]   ;;  %v1520_v27 = vld [vmem:[#allocation2 + $0xe0] ss:$8 sps:$4 sm:$0xff]   ;;  %595 = vmatprep.subr.bf16.mxu1 %v1516_v20 }
  0x41   : > { %v891_v17 = vrot.slane %v889_v4, 1  ;;  %v304_v23 = vor.u32 %v303_v12, %v299_v56  ;;  %v1521_v28 = vld [vmem:[#allocation2 + $0x20] ss:$8 sps:$4 sm:$0xff]   ;;  %v297_v30 = vor.u32 %v296_v63, %v292_v54  ;;  %v1522_v32 = vld [vmem:[#allocation2 + $0xf4] ss:$8 sps:$4 sm:$0xff]   ;;  %v324_v33 = vrot.slane %v1775_v8, 1  ;;  %812 = vmatprep.subr.bf16.mxu0 %v1518_v24 }
  0x42   : > { %v1294_v34 = vcombine.low %v322_v21, %v323_v22  ;;  %v321_v35 = vrot.slane %v1772_v7, 1  ;;  %v1524_v3 = vld [vmem:[#allocation2 + $0x34] ss:$8 sps:$4 sm:$0xff]   ;;  %v325_v14 = vrot.slane %v1801_v25, 1  ;;  %v326_v38 = vrot.slane %v1807_v29, 1  ;;  %596 = vmatpush1.bf16.msra.mxu1 %v1520_v27 }
  0x43   : > { %315 = vrot.lane.b32.xlu1 %v290_v62, %s1671_s7  ;;  %v1858_v36 = vcombine.low %v323_v22, %v324_v33  ;;  %v892_v39 = vor.u32 %v891_v17, %v887_v1  ;;  %v1526_v8 = vld [vmem:[#allocation2 + $0xf0] ss:$8 sps:$4 sm:$0xff]   ;;  %v327_v7 = vrot.slane %v1824_v44, 1  ;;  %v413_v42 = vor.u32 %v412_v13, %v408_v59  ;;  %813 = vmatpush1.bf16.msra.mxu0 %v1521_v28  ;;  %v1528_v43 = vld [vmem:[#allocation2 + $0x104] ss:$8 sps:$4 sm:$0xff]  }
  0x44   : > { %313 = vrot.lane.b32.xlu0 %v283_v10, %s1671_s7  ;;  %1325 = vmatprep.mubr.msk.bf16.mxu1 %vm329_vm0, %v1294_v34  ;;  %v1330_v37 = vcombine.low %v321_v35, %v322_v21  ;;  %v1862_v41 = vcombine.low %v324_v33, %v325_v14  ;;  %v1527_v25 = vld [vmem:[#allocation2 + $0x30] ss:$8 sps:$4 sm:$0xff]   ;;  %v1866_v47 = vcombine.low %v325_v14, %v326_v38  ;;  %v1530_v29 = vld [vmem:[#allocation2 + $0x44] ss:$8 sps:$4 sm:$0xff]   ;;  %v1532_v49 = vld [vmem:[#allocation2 + $0x100] ss:$8 sps:$4 sm:$0xff]  }
  0x45   : > { %597 = vmatprep.subr.bf16.mxu1 %v1522_v32  ;;  %814 = vmatprep.subr.bf16.mxu0 %v1524_v3  ;;  %v1868_v48 = vcombine.low %v326_v38, %v327_v7  ;;  %v1533_v44 = vld [vmem:[#allocation2 + $0x40] ss:$8 sps:$4 sm:$0xff]   ;;  %v328_v54 = vrot.slane %v1827_v45, 1  ;;  %v1538_v55 = vld [vmem:[#allocation2 + $0x110] ss:$8 sps:$4 sm:$0xff]   ;;  %v416_v56 = vrot.slane %v1835_v50, 1 }
  0x46   : > { %1361 = vmatprep.mubr.msk.bf16.mxu0 %vm329_vm0, %v1330_v37  ;;  %598 = vmatpush1.bf16.msra.mxu1 %v1526_v8  ;;  %v1540_v58 = vld [vmem:[#allocation2 + $0x124] ss:$8 sps:$4 sm:$0xff]   ;;  %v1544_v62 = vld [vmem:[#allocation2 + $0x120] ss:$8 sps:$4 sm:$0xff]   ;;  %v1546_v45 = vld [vmem:[#allocation2 + $0x134] ss:$8 sps:$4 sm:$0xff]  }
  0x47   : > { %319 = vrot.lane.b32.xlu1 %v304_v23, %s1671_s7  ;;  %815 = vmatpush1.bf16.msra.mxu0 %v1527_v25  ;;  %v1875_v59 = vcombine.low %v327_v7, %v328_v54  ;;  %v1542_v60 = vld [vmem:[#allocation2 + $0x64] ss:$8 sps:$4 sm:$0xff]   ;;  %v1877_v61 = vcombine.low %v328_v54, %v416_v56  ;;  %v1545_v63 = vld [vmem:[#allocation2 + $0x60] ss:$8 sps:$4 sm:$0xff]   ;;  %v1548_v1 = vld [vmem:[#allocation2 + $0x74] ss:$8 sps:$4 sm:$0xff]  }
  0x48   : > { %317 = vrot.lane.b32.xlu0 %v297_v30, %s1671_s7  ;;  %599 = vmatprep.subr.bf16.mxu1 %v1528_v43  ;;  %v1550_v50 = vld [vmem:[#allocation2 + $0x130] ss:$8 sps:$4 sm:$0xff]   ;;  %v1552_v6 = vld [vmem:[#allocation2 + $0x144] ss:$8 sps:$4 sm:$0xff]   ;;  %v1556_v12 = vld [vmem:[#allocation2 + $0x140] ss:$8 sps:$4 sm:$0xff]  }
  0x49   : > { %816 = vmatprep.subr.bf16.mxu0 %v1530_v29  ;;  %v1551_v4 = vld [vmem:[#allocation2 + $0x70] ss:$8 sps:$4 sm:$0xff]   ;;  %v1554_v10 = vld [vmem:[#allocation2 + $0x84] ss:$8 sps:$4 sm:$0xff]   ;;  %v1557_v13 = vld [vmem:[#allocation2 + $0x80] ss:$8 sps:$4 sm:$0xff]  }
  0x4a   : > { %600 = vmatpush1.bf16.msra.mxu1 %v1532_v49  ;;  %v1558_v15 = vld [vmem:[#allocation2 + $0x154] ss:$8 sps:$4 sm:$0xff]   ;;  %v1562_v18 = vld [vmem:[#allocation2 + $0x150] ss:$8 sps:$4 sm:$0xff]   ;;  %v1564_v20 = vld [vmem:[#allocation2 + $0x164] ss:$8 sps:$4 sm:$0xff]  }
  0x4b   : > { %893 = vrot.lane.b32.xlu1 %v892_v39, %s1671_s7  ;;  %817 = vmatpush1.bf16.msra.mxu0 %v1533_v44  ;;  %v1560_v17 = vld [vmem:[#allocation2 + $0x94] ss:$8 sps:$4 sm:$0xff]   ;;  %v1563_v19 = vld [vmem:[#allocation2 + $0x90] ss:$8 sps:$4 sm:$0xff]   ;;  %v1566_v21 = vld [vmem:[#allocation2 + $0xa4] ss:$8 sps:$4 sm:$0xff]  }
  0x4c   : > { %414 = vrot.lane.b32.xlu0 %v413_v42, %s1671_s7  ;;  %601 = vmatprep.subr.bf16.mxu1 %v1534_v52  ;;  %v1568_v22 = vld [vmem:[#allocation2 + $0x160] ss:$8 sps:$4 sm:$0xff]   ;;  %v1570_v24 = vld [vmem:[#allocation2 + $0x174] ss:$8 sps:$4 sm:$0xff]   ;;  %v1574_v28 = vld [vmem:[#allocation2 + $0x170] ss:$8 sps:$4 sm:$0xff]  }
  0x4d   : > { %818 = vmatprep.subr.bf16.mxu0 %v1536_v53  ;;  %v1569_v23 = vld [vmem:[#allocation2 + $0xa0] ss:$8 sps:$4 sm:$0xff]   ;;  %v1572_v27 = vld [vmem:[#allocation2 + $0xb4] ss:$8 sps:$4 sm:$0xff]   ;;  %v1575_v30 = vld [vmem:[#allocation2 + $0xb0] ss:$8 sps:$4 sm:$0xff]  }
  0x4e   : > { %602 = vmatpush1.bf16.msra.mxu1 %v1538_v55  ;;  %v895_v32 = vrot.slane %v1838_v51, 1  ;;  %v1578_v33 = vld [vmem:[#allocation2 + $0x184] ss:$8 sps:$4 sm:$0xff]   ;;  %v1576_v39 = vld [vmem:[#allocation2 + $0x180] ss:$8 sps:$4 sm:$0xff]  }
  0x4f   : > { %819 = vmatpush1.bf16.msra.mxu0 %v1539_v57  ;;  %603 = vmatprep.subr.bf16.mxu1 %v1540_v58  ;;  %v1581_v42 = vld [vmem:[#allocation2 + $0x194] ss:$8 sps:$4 sm:$0xff]   ;;  %v1579_v29 = vld [vmem:[#allocation2 + $0x190] ss:$8 sps:$4 sm:$0xff]   ;;  %v1582_v44 = vld [vmem:[#allocation2 + $0x1a0] ss:$8 sps:$4 sm:$0xff]  }
  0x50   : > { %820 = vmatprep.subr.bf16.mxu0 %v1542_v60  ;;  %v1880_v34 = vcombine.low %v416_v56, %v895_v32  ;;  %v1590_v56 = vld [vmem:[#allocation2 + $0x1c4] ss:$8 sps:$4 sm:$0xff]   ;;  %v1588_v60 = vld [vmem:[#allocation2 + $0x1c0] ss:$8 sps:$4 sm:$0xff]  }
  0x52   : > { %604 = vmatpush1.bf16.msra.mxu1 %v1544_v62 }
  0x53   : > { %821 = vmatpush1.bf16.msra.mxu0 %v1545_v63  ;;  %605 = vmatprep.subr.bf16.mxu1 %v1546_v45 }
  0x54   : > { %822 = vmatprep.subr.bf16.mxu0 %v1548_v1  ;;  %v1596_v1 = vld [vmem:[#allocation2 + $0x1e4] ss:$8 sps:$4 sm:$0xff]  }
  0x56   : > { %606 = vmatpush1.bf16.msra.mxu1 %v1550_v50 }
  0x57   : > { %823 = vmatpush1.bf16.msra.mxu0 %v1551_v4  ;;  %607 = vmatprep.subr.bf16.mxu1 %v1552_v6  ;;  %v1594_v6 = vld [vmem:[#allocation2 + $0x1e0] ss:$8 sps:$4 sm:$0xff]  }
  0x58   : > { %824 = vmatprep.subr.bf16.mxu0 %v1554_v10  ;;  %v1602_v10 = vld [vmem:[#allocation2 + $0x204] ss:$8 sps:$4 sm:$0xff]  }
  0x5a   : > { %608 = vmatpush1.bf16.msra.mxu1 %v1556_v12  ;;  %v1605_v12 = vld [vmem:[#allocation2 + $0x214] ss:$8 sps:$4 sm:$0xff]  }
  0x5b   : > { %825 = vmatpush1.bf16.msra.mxu0 %v1557_v13  ;;  %609 = vmatprep.subr.bf16.mxu1 %v1558_v15  ;;  %v1603_v13 = vld [vmem:[#allocation2 + $0x210] ss:$8 sps:$4 sm:$0xff]   ;;  %v1608_v15 = vld [vmem:[#allocation2 + $0x224] ss:$8 sps:$4 sm:$0xff]  }
  0x5c   : > { %826 = vmatprep.subr.bf16.mxu0 %v1560_v17  ;;  %v1606_v17 = vld [vmem:[#allocation2 + $0x220] ss:$8 sps:$4 sm:$0xff]  }
  0x5e   : > { %610 = vmatpush1.bf16.msra.mxu1 %v1562_v18 }
  0x5f   : > { %827 = vmatpush1.bf16.msra.mxu0 %v1563_v19  ;;  %611 = vmatprep.subr.bf16.mxu1 %v1564_v20 }
  0x60   : > { %828 = vmatprep.subr.bf16.mxu0 %v1566_v21 }
  0x62   : > { %612 = vmatpush1.bf16.msra.mxu1 %v1568_v22 }
  0x63   : > { %829 = vmatpush1.bf16.msra.mxu0 %v1569_v23  ;;  %613 = vmatprep.subr.bf16.mxu1 %v1570_v24 }
  0x64   : > { %830 = vmatprep.subr.bf16.mxu0 %v1572_v27 }
  0x66   : > { %614 = vmatpush1.bf16.msra.mxu1 %v1574_v28 }
  0x67   : > { %831 = vmatpush1.bf16.msra.mxu0 %v1575_v30  ;;  %1399 = vmatprep.subr.bf16.mxu1 %v1578_v33 }
  0x68   : > { %1052 = vmatprep.subr.bf16.mxu0 %v1578_v33 }
  0xad   : > { %v310_v3 = vpop.permute.xlu1 %309 }
  0xae   : > { %v306_v35 = vpop.permute.xlu0 %305  ;;  %v338_v14 = vsel %vm329_vm0, %v1757_v0, %v310_v3 }
  0xaf   : > { %v332_v38 = vsel %vm329_vm0, %v1761_v2, %v306_v35  ;;  %v1584_v2 = vld [vmem:[#allocation2 + $0x1a4] ss:$8 sps:$4 sm:$0xff]  }
  0xb1   : > { %v312_v25 = vpop.permute.xlu1 %311 }
  0xb2   : > { %v308_v37 = vpop.permute.xlu0 %307 }
  0xb3   : > { %v335_v51 = vsel %vm329_vm0, %v1778_v9, %v308_v37  ;;  %v341_v9 = vsel %vm329_vm0, %v1768_v5, %v312_v25  ;;  %v1585_v5 = vld [vmem:[#allocation2 + $0x1b0] ss:$8 sps:$4 sm:$0xff]  }
  0xb4   : > { %v1293_v8 = vcombine.low %v335_v51, %v338_v14  ;;  %v1329_v7 = vcombine.low %v332_v38, %v335_v51  ;;  %v1896_v52 = vcombine.low %v338_v14, %v341_v9 }
  0xb5   : > { %v316_v53 = vpop.permute.xlu1 %315 }
  0xb6   : > { %624 = vmatmul.mubr.bf16.vlgmr.msra.gmra.mrb[0].mxu1 %v1293_v8  ;;  %841 = vmatmul.mubr.bf16.vlgmr.msra.gmra.mrb[0].mxu0 %v1329_v7  ;;  %v314_v43 = vpop.permute.xlu0 %313 }
  0xb7   : > { %1053 = vmatpush1.bf16.msra.mxu0 %v1576_v39  ;;  %1411 = vmatpush1.bf16.msra.mxu1 %v1576_v39  ;;  %v344_v0 = vsel %vm329_vm0, %v1782_v11, %v314_v43  ;;  %v1587_v11 = vld [vmem:[#allocation2 + $0x1b4] ss:$8 sps:$4 sm:$0xff]  }
  0xb8   : > { %1054 = vmatprep.subr.bf16.mxu0 %v1581_v42  ;;  %1400 = vmatprep.subr.bf16.mxu1 %v1581_v42  ;;  %v1295_v49 = vcombine.low %v341_v9, %v344_v0 }
  0xb9   : > { %1362 = vmatprep.mubr.msk.bf16.mxu0 %vm329_vm0, %v1858_v36  ;;  %1326 = vmatprep.mubr.msk.bf16.mxu1 %vm329_vm0, %v1862_v41  ;;  %v347_v41 = vsel %vm329_vm0, %v1791_v16, %v316_v53  ;;  %v1593_v16 = vld [vmem:[#allocation2 + $0x1d4] ss:$8 sps:$4 sm:$0xff]   ;;  %v320_v62 = vpop.permute.xlu1 %319 }
  0xba   : > { %v318_v54 = vpop.permute.xlu0 %317  ;;  %v1907_v57 = vcombine.low %v344_v0, %v347_v41  ;;  %v353_v63 = vsel %vm329_vm0, %v1811_v31, %v320_v62  ;;  %v1599_v31 = vld [vmem:[#allocation2 + $0x1f4] ss:$8 sps:$4 sm:$0xff]  }
  0xbb   : > { %1055 = vmatpush1.bf16.msra.mxu0 %v1579_v29  ;;  %1412 = vmatpush1.bf16.msra.mxu1 %v1579_v29  ;;  %v350_v55 = vsel %vm329_vm0, %v1804_v26, %v318_v54 }
  0xbc   : > { %1056 = vmatprep.subr.bf16.mxu0 %v1584_v2  ;;  %1401 = vmatprep.subr.bf16.mxu1 %v1584_v2  ;;  %v1297_v58 = vcombine.low %v347_v41, %v350_v55  ;;  %v1335_v50 = vcombine.low %v350_v55, %v353_v63 }
  0xbd   : > { %v894_v18 = vpop.permute.xlu1 %893 }
  0xbe   : > { %851 = vmatmul.mubr.bf16.gmra.mrb[4].mxu0 %v1896_v52  ;;  %634 = vmatmul.mubr.bf16.gmra.mrb[4].mxu1 %v1295_v49  ;;  %v415_v26 = vpop.permute.xlu0 %414  ;;  %v898_v19 = vsel %vm329_vm0, %v1830_v46, %v894_v18 }
  0xbf   : > { %1057 = vmatpush1.bf16.msra.mxu0 %v1582_v44  ;;  %1413 = vmatpush1.bf16.msra.mxu1 %v1582_v44  ;;  %v419_v45 = vsel %vm329_vm0, %v1819_v40, %v415_v26  ;;  %v1597_v40 = vld [vmem:[#allocation2 + $0x1f0] ss:$8 sps:$4 sm:$0xff]  }
  0xc0   : > { %1058 = vmatprep.subr.bf16.mxu0 %v1587_v11  ;;  %1402 = vmatprep.subr.bf16.mxu1 %v1587_v11  ;;  %v1299_v4 = vcombine.low %v353_v63, %v419_v45  ;;  %v1366_v20 = vcombine.low %v419_v45, %v898_v19 }
  0xc1   : > { %1327 = vmatprep.mubr.msk.bf16.mxu1 %vm329_vm0, %v1868_v48  ;;  %1363 = vmatprep.mubr.msk.bf16.mxu0 %vm329_vm0, %v1866_v47  ;;  %v1591_v48 = vld [vmem:[#allocation2 + $0x1d0] ss:$8 sps:$4 sm:$0xff]  }
  0xc3   : > { %1059 = vmatpush1.bf16.msra.mxu0 %v1585_v5  ;;  %1414 = vmatpush1.bf16.msra.mxu1 %v1585_v5 }
  0xc4   : > { %1060 = vmatprep.subr.bf16.mxu0 %v1590_v56  ;;  %1403 = vmatprep.subr.bf16.mxu1 %v1590_v56 }
  0xc6   : > { %644 = vmatmul.mubr.bf16.gmra.mrb[8].mxu1 %v1297_v58  ;;  %861 = vmatmul.mubr.bf16.gmra.mrb[8].mxu0 %v1907_v57 }
  0xc7   : > { %1061 = vmatpush1.bf16.msra.mxu0 %v1588_v60  ;;  %1415 = vmatpush1.bf16.msra.mxu1 %v1588_v60 }
  0xc8   : > { %1062 = vmatprep.subr.bf16.mxu0 %v1593_v16  ;;  %1404 = vmatprep.subr.bf16.mxu1 %v1593_v16 }
  0xc9   : > { %1328 = vmatprep.mubr.msk.bf16.mxu1 %vm329_vm0, %v1877_v61  ;;  %1364 = vmatprep.mubr.msk.bf16.mxu0 %vm329_vm0, %v1875_v59  ;;  %v1600_v61 = vld [vmem:[#allocation2 + $0x200] ss:$8 sps:$4 sm:$0xff]  }
  0xcb   : > { %1063 = vmatpush1.bf16.msra.mxu0 %v1591_v48  ;;  %1416 = vmatpush1.bf16.msra.mxu1 %v1591_v48 }
  0xcc   : > { %1064 = vmatprep.subr.bf16.mxu0 %v1596_v1  ;;  %1405 = vmatprep.subr.bf16.mxu1 %v1596_v1 }
  0xce   : > { %654 = vmatmul.mubr.bf16.gmra.mrb[12].mxu1 %v1299_v4  ;;  %871 = vmatmul.mubr.bf16.gmra.mrb[12].mxu0 %v1335_v50 }
  0xcf   : > { %1065 = vmatpush1.bf16.msra.mxu0 %v1594_v6  ;;  %1417 = vmatpush1.bf16.msra.mxu1 %v1594_v6 }
  0xd0   : > { %1066 = vmatprep.subr.bf16.mxu0 %v1599_v31  ;;  %1406 = vmatprep.subr.bf16.mxu1 %v1599_v31 }
  0xd1   : > { %1392 = vmatprep.mubr.msk.bf16.mxu0 %vm329_vm0, %v1858_v36  ;;  %1394 = vmatprep.mubr.msk.bf16.mxu1 %vm329_vm0, %v1875_v59  ;;  %v1611_v36 = vld [vmem:[#allocation2 + $0x234] ss:$8 sps:$4 sm:$0xff]   ;;  %v1609_v59 = vld [vmem:[#allocation2 + $0x230] ss:$8 sps:$4 sm:$0xff]  }
  0xd3   : > { %1067 = vmatpush1.bf16.msra.mxu0 %v1597_v40  ;;  %1418 = vmatpush1.bf16.msra.mxu1 %v1597_v40 }
  0xd4   : > { %1068 = vmatprep.subr.bf16.mxu0 %v1602_v10  ;;  %1407 = vmatprep.subr.bf16.mxu1 %v1602_v10 }
  0xd7   : > { %1069 = vmatpush1.bf16.msra.mxu0 %v1600_v61  ;;  %1419 = vmatpush1.bf16.msra.mxu1 %v1600_v61 }
  0xd8   : > { %1070 = vmatprep.subr.bf16.mxu0 %v1605_v12  ;;  %1408 = vmatprep.subr.bf16.mxu1 %v1605_v12 }
  0xdb   : > { %1071 = vmatpush1.bf16.msra.mxu0 %v1603_v13  ;;  %1420 = vmatpush1.bf16.msra.mxu1 %v1603_v13 }
  0xdc   : > { %1072 = vmatprep.subr.bf16.mxu0 %v1608_v15  ;;  %1409 = vmatprep.subr.bf16.mxu1 %v1608_v15 }
  0xdf   : > { %1073 = vmatpush1.bf16.msra.mxu0 %v1606_v17  ;;  %1421 = vmatpush1.bf16.msra.mxu1 %v1606_v17 }
  0xe0   : > { %1074 = vmatprep.subr.bf16.mxu0 %v1611_v36  ;;  %1410 = vmatprep.subr.bf16.mxu1 %v1611_v36 }
  0xe3   : > { %1075 = vmatpush1.bf16.msra.mxu0 %v1609_v59  ;;  %1422 = vmatpush1.bf16.msra.mxu1 %v1609_v59 }
  0xe6   : > { %1085 = vmatmul.mubr.bf16.vlgmr.msra.gmra.mrb[0].mxu0 %v1896_v52  ;;  %1105 = vmatmul.mubr.bf16.vlgmr.msra.gmra.mrb[16].mxu1 %v1335_v50 }
  0xe7   : > { %1393 = vmatprep.mubr.msk.bf16.mxu0 %vm329_vm0, %v1866_v47  ;;  %1395 = vmatprep.mubr.msk.bf16.mxu1 %vm329_vm0, %v1880_v34 }
  0xee   : > { %1095 = vmatmul.mubr.bf16.gmra.mrb[4].mxu0 %v1907_v57  ;;  %1115 = vmatmul.mubr.bf16.gmra.mrb[20].mxu1 %v1366_v20 }
 0x189   : > { %v625_v21 = vpop.f32.mrb[0].mxu1 }
 0x18a   : > { %v627_v22 = vpop.f32.mrb[1].mxu1 }
 0x18b   : > { %v629_v23 = vpop.f32.mrb[2].mxu1 }
 0x18c   : > { %v631_v24 = vpop.f32.mrb[3].mxu1 }
 0x191   : > { %v1930_v27 = vpop.f32.mrb[4].mxu1 }
 0x192   : > { %v1932_v28 = vpop.f32.mrb[5].mxu1 }
 0x193   : > { %v1934_v30 = vpop.f32.mrb[6].mxu1 }
 0x194   : > { %v1936_v47 = vpop.f32.mrb[7].mxu1 }
 0x199   : > { %v645_v32 = vpop.f32.mrb[8].mxu1  ;;  %v862_v33 = vpop.f32.mrb[8].mxu0 }
 0x19a   : > { %v863_v34 = vadd.f32 %v862_v33, %v645_v32  ;;  %v647_v46 = vpop.f32.mrb[9].mxu1  ;;  %v864_v35 = vpop.f32.mrb[9].mxu0 }
 0x19b   : > { %v865_v3 = vadd.f32 %v864_v35, %v647_v46  ;;  %v649_v14 = vpop.f32.mrb[10].mxu1  ;;  %v866_v37 = vpop.f32.mrb[10].mxu0 }
 0x19c   : > { %v867_v38 = vadd.f32 %v866_v37, %v649_v14  ;;  %v651_v51 = vpop.f32.mrb[11].mxu1  ;;  %v868_v39 = vpop.f32.mrb[11].mxu0 }
 0x19d   : > { %v869_v8 = vadd.f32 %v868_v39, %v651_v51 }
 0x1a1   : > { %v655_v7 = vpop.f32.mrb[12].mxu1  ;;  %v872_v42 = vpop.f32.mrb[12].mxu0 }
 0x1a2   : > { %v873_v25 = vadd.f32 %v872_v42, %v655_v7  ;;  %v657_v43 = vpop.f32.mrb[13].mxu1  ;;  %v874_v29 = vpop.f32.mrb[13].mxu0 }
 0x1a3   : > { %v875_v0 = vadd.f32 %v874_v29, %v657_v43  ;;  %v659_v2 = vpop.f32.mrb[14].mxu1  ;;  %v876_v9 = vpop.f32.mrb[14].mxu0 }
 0x1a4   : > { %v877_v49 = vadd.f32 %v876_v9, %v659_v2  ;;  %v661_v44 = vpop.f32.mrb[15].mxu1  ;;  %v878_v52 = vpop.f32.mrb[15].mxu0 }
 0x1a5   : > { %v879_v11 = vadd.f32 %v878_v52, %v661_v44 }
 0x1b9   : > { %v1086_v53 = vpop.f32.mrb[0].mxu0  ;;  %v1106_v54 = vpop.f32.mrb[16].mxu1 }
 0x1ba   : > { %v1423_v5 = vadd.f32 %v1086_v53, %v625_v21  ;;  %v1133_v41 = vadd.f32 %v1106_v54, %v863_v34  ;;  %v1088_v55 = vpop.f32.mrb[1].mxu0  ;;  %v1108_v56 = vpop.f32.mrb[17].mxu1 }
 0x1bb   : > { %v1424_v57 = vadd.f32 %v1088_v55, %v627_v22  ;;  %v1134_v58 = vadd.f32 %v1108_v56, %v865_v3  ;;  %v1090_v60 = vpop.f32.mrb[2].mxu0  ;;  %v1110_v16 = vpop.f32.mrb[18].mxu1 }
 0x1bc   : > { %v1141_v62 = vmax.f32 %v1423_v5, 0.0  ;;  %v1149_v26 = vmax.f32 %v1133_v41, 0.0  ;;  %v1425_v48 = vadd.f32 %v1090_v60, %v629_v23  ;;  %v1135_v63 = vadd.f32 %v1110_v16, %v867_v38  ;;  %v1092_v45 = vpop.f32.mrb[3].mxu0  ;;  %v1112_v1 = vpop.f32.mrb[19].mxu1 }
 0x1bd   : > { %v1142_v50 = vmax.f32 %v1424_v57, 0.0  ;;  %v1150_v4 = vmax.f32 %v1134_v58, 0.0  ;;  %v1426_v6 = vadd.f32 %v1092_v45, %v631_v24  ;;  %v1136_v31 = vadd.f32 %v1112_v1, %v869_v8 }
 0x1be   : > { %1157 = vst [vmem:[%s1942_s15] sm:$0xff] %v1141_v62  ;;  %1165 = vst [vmem:[%s1942_s15 + $0x40] sm:$0xff] %v1149_v26  ;;  %v1143_v40 = vmax.f32 %v1425_v48, 0.0  ;;  %v1151_v10 = vmax.f32 %v1135_v63, 0.0 }
 0x1bf   : > { %1158 = vst [vmem:[%s1942_s15 + $0x8] sm:$0xff] %v1142_v50  ;;  %1166 = vst [vmem:[%s1942_s15 + $0x48] sm:$0xff] %v1150_v4  ;;  %v1144_v61 = vmax.f32 %v1426_v6, 0.0  ;;  %v1152_v12 = vmax.f32 %v1136_v31, 0.0 }
 0x1c0   : > { %1159 = vst [vmem:[%s1942_s15 + $0x10] sm:$0xff] %v1143_v40  ;;  %1167 = vst [vmem:[%s1942_s15 + $0x50] sm:$0xff] %v1151_v10 }
 0x1c1   : > { %1160 = vst [vmem:[%s1942_s15 + $0x18] sm:$0xff] %v1144_v61  ;;  %1168 = vst [vmem:[%s1942_s15 + $0x58] sm:$0xff] %v1152_v12  ;;  %v1096_v13 = vpop.f32.mrb[4].mxu0  ;;  %v1116_v15 = vpop.f32.mrb[20].mxu1 }
 0x1c2   : > { %v1427_v17 = vadd.f32 %v1096_v13, %v1930_v27  ;;  %v1137_v36 = vadd.f32 %v1116_v15, %v873_v25  ;;  %v1098_v59 = vpop.f32.mrb[5].mxu0  ;;  %v1118_v18 = vpop.f32.mrb[21].mxu1 }
 0x1c3   : > { %v1428_v19 = vadd.f32 %v1098_v59, %v1932_v28  ;;  %v1138_v20 = vadd.f32 %v1118_v18, %v875_v0  ;;  %v1100_v21 = vpop.f32.mrb[6].mxu0  ;;  %v1120_v22 = vpop.f32.mrb[22].mxu1 }
 0x1c4   : > { %v1145_v23 = vmax.f32 %v1427_v17, 0.0  ;;  %v1153_v24 = vmax.f32 %v1137_v36, 0.0  ;;  %v1429_v32 = vadd.f32 %v1100_v21, %v1934_v30  ;;  %v1139_v33 = vadd.f32 %v1120_v22, %v877_v49  ;;  %v1102_v27 = vpop.f32.mrb[7].mxu0  ;;  %v1122_v34 = vpop.f32.mrb[23].mxu1 }
 0x1c5   : > { %v1146_v46 = vmax.f32 %v1428_v19, 0.0  ;;  %v1154_v35 = vmax.f32 %v1138_v20, 0.0  ;;  %v1430_v28 = vadd.f32 %v1102_v27, %v1936_v47  ;;  %v1140_v3 = vadd.f32 %v1122_v34, %v879_v11 }
 0x1c6   : > { %1161 = vst [vmem:[%s1942_s15 + $0x20] sm:$0xff] %v1145_v23  ;;  %1169 = vst [vmem:[%s1942_s15 + $0x60] sm:$0xff] %v1153_v24  ;;  %v1147_v14 = vmax.f32 %v1429_v32, 0.0  ;;  %v1155_v37 = vmax.f32 %v1139_v33, 0.0 }
 0x1c7   : > { %1162 = vst [vmem:[%s1942_s15 + $0x28] sm:$0xff] %v1146_v46  ;;  %1170 = vst [vmem:[%s1942_s15 + $0x68] sm:$0xff] %v1154_v35  ;;  %v1148_v38 = vmax.f32 %v1430_v28, 0.0  ;;  %v1156_v30 = vmax.f32 %v1140_v3, 0.0 }
 0x1c8   : > { %1163 = vst [vmem:[%s1942_s15 + $0x30] sm:$0xff] %v1147_v14  ;;  %1171 = vst [vmem:[%s1942_s15 + $0x70] sm:$0xff] %v1155_v37 }
 0x1c9   : > { %1164 = vst [vmem:[%s1942_s15 + $0x38] sm:$0xff] %v1148_v38  ;;  %1172 = vst [vmem:[%s1942_s15 + $0x78] sm:$0xff] %v1156_v30 }
 0x1ca PF: > { %s13_s11 = sadd.s32 1, %s1666_s11   ;;  %s1984_s9 = smov %s1662_s10 }
 0x1cb   : > { %p10_p4 = scmp.ge.s32.totalorder %s13_s11, 4   ;;  %s1985_s10 = smov %s1987_s13 }
 0x1cd   :  { %12 = sbr.rel (!%p10_p4) target bundleno = 2 (0x2), region = 64 }
 0x1d4   :  { %1205 = vsyncpa [#allocation3], 1 }
 0x1d5   :  { %1207 = vsyncpa [#allocation3 + $0x1], 1 }

</bundles_post_ra>
